<compile_context>
chip_gen: v5e
topology: v5e:2x2
jax: 0.10.0
libtpu: 0.0.40
codegen_flags: <defaults>
</compile_context>

<pallas_src>
import functools

import jax
import jax.numpy as jnp
import numpy as np
from jax.experimental import pallas as pl
from jax.experimental.pallas import tpu as pltpu

GAMMA = 1.5
ALPHA = 0.25
_LANES = 128
_SUBLANES = 8


def _focal_loss_kernel(pred_ref, true_ref, out_ref, *, gamma, alpha):
    # Grid: (cores, steps). Axis 0 is "parallel" (one output block per core);
    # axis 1 is the "arbitrary" reduction axis — the (8,128) output block is
    # resident across it and acts as the accumulator (no VMEM scratch needed).
    i = pl.program_id(1)

    @pl.when(i == 0)
    def _():
        out_ref[...] = jnp.zeros_like(out_ref)

    x = pred_ref[...].astype(jnp.float32)
    y = true_ref[...].astype(jnp.float32)

    # Share a single EUP exp between the stable BCE log-term and the sigmoid:
    #   e = exp(-|x|)
    #   BCE_with_logits = max(x,0) - x*y + log1p(e)
    #   sigmoid(x)      = 1/(1+e)  if x >= 0 else e/(1+e)
    e = jnp.exp(-jnp.abs(x))
    bce = jnp.maximum(x, 0.0) - x * y + jnp.log1p(e)

    inv = 1.0 / (1.0 + e)
    p = jnp.where(x >= 0.0, inv, e * inv)

    p_t = y * p + (1.0 - y) * (1.0 - p)
    alpha_factor = y * alpha + (1.0 - y) * (1.0 - alpha)
    one_m_pt = jnp.maximum(1.0 - p_t, 0.0)  # guard sqrt against -1ulp rounding
    if float(gamma) == 1.5:
        # (1-p_t)**1.5 == (1-p_t) * sqrt(1-p_t): one sqrt vs exp∘log for pow.
        modulating = one_m_pt * jnp.sqrt(one_m_pt)
    elif float(gamma) == int(gamma):
        modulating = one_m_pt ** int(gamma)
    else:
        modulating = jnp.power(one_m_pt, gamma)

    loss = bce * alpha_factor * modulating

    # Per-step reduction stays on the VPU: fold the (tile_rows,128) tile down
    # to one (8,128) vreg by summing sublane-stacked groups. The single
    # cross-lane reduce to a scalar happens once, in the wrapper.
    out_ref[...] += loss.reshape(-1, _SUBLANES, _LANES).sum(axis=0)


def focal_loss(pred, true, gamma=GAMMA, alpha=ALPHA):
    """Mean focal BCE-with-logits loss (scalar). pred/true: same shape."""
    assert pred.shape == true.shape
    n_total = int(np.prod(pred.shape))
    assert n_total % (_SUBLANES * _LANES) == 0, (
        "wrapper assumes total element count divisible by 8*128"
    )
    rows = n_total // _LANES

    pred2d = pred.reshape(rows, _LANES)
    true2d = true.reshape(rows, _LANES)

    # Split rows across 2 TensorCores when evenly possible (megacore on v7x;
    # serialized and harmless on single-TC v5e/v6e).
    row_blocks = rows // _SUBLANES
    cores = 2 if row_blocks % 2 == 0 else 1
    rows_per_core = rows // cores

    # Largest row tile (multiple of 8) dividing rows_per_core, capped at 1024
    # rows: 1024*128*4 B = 512 KiB/buffer -> 2 inputs * 2 pipeline buffers =
    # 2 MiB resident, far under v5e's 16 MiB scoped VMEM and v7x's 64 MiB.
    tile_rows = min(rows_per_core, 1024)
    while rows_per_core % tile_rows != 0:
        tile_rows -= _SUBLANES
    steps = rows_per_core // tile_rows

    kernel = functools.partial(_focal_loss_kernel, gamma=gamma, alpha=alpha)
    in_map = lambda c, i: (c * steps + i, 0)

    partials = pl.pallas_call(
        kernel,
        out_shape=jax.ShapeDtypeStruct((cores * _SUBLANES, _LANES), jnp.float32),
        grid=(cores, steps),
        in_specs=[
            pl.BlockSpec((tile_rows, _LANES), in_map),
            pl.BlockSpec((tile_rows, _LANES), in_map),
        ],
        out_specs=pl.BlockSpec((_SUBLANES, _LANES), lambda c, i: (c, 0)),
        compiler_params=pltpu.CompilerParams(
            dimension_semantics=("parallel", "arbitrary")
        ),
    )(pred2d, true2d)

    # Single cross-lane reduction + mean (multiply by baked-in 1/N), done once.
    return jnp.sum(partials) * jnp.float32(1.0 / n_total)


def _focal_loss_ref(pred, true, gamma=GAMMA, alpha=ALPHA):
    x = pred.astype(jnp.float32)
    y = true.astype(jnp.float32)
    bce = jnp.maximum(x, 0.0) - x * y + jnp.log1p(jnp.exp(-jnp.abs(x)))
    p = jax.nn.sigmoid(x)
    p_t = y * p + (1.0 - y) * (1.0 - p)
    af = y * alpha + (1.0 - y) * (1.0 - alpha)
    mf = jnp.power(1.0 - p_t, gamma)
    return jnp.mean(bce * af * mf)


if __name__ == "__main__":
    key = jax.random.PRNGKey(0)
    k1, k2 = jax.random.split(key)
    # NCHW logits and binary-ish targets, small shapes.
    pred = jax.random.normal(k1, (2, 4, 16, 16), dtype=jnp.float32) * 2.0
    true = (jax.random.uniform(k2, (2, 4, 16, 16)) > 0.7).astype(jnp.float32)

    out = focal_loss(pred, true)
    out = jax.block_until_ready(out)

    ref = _focal_loss_ref(pred, true)
    assert np.allclose(np.asarray(out), np.asarray(ref), rtol=1e-5, atol=1e-6), (
        float(out),
        float(ref),
    )
    print("KERNEL_OK")
</pallas_src>

<mosaic_0001>
module attributes {stable_mosaic.version = 11 : i64} {
  func.func @_focal_loss_kernel(%arg0: i32, %arg1: i32, %arg2: memref<8x128xf32, #tpu.memory_space<vmem>>, %arg3: memref<8x128xf32, #tpu.memory_space<vmem>>, %arg4: memref<8x128xf32, #tpu.memory_space<vmem>>) attributes {dimension_semantics = [#tpu.dimension_semantics<parallel>, #tpu.dimension_semantics<arbitrary>], iteration_bounds = array<i64: 2, 1>, scalar_prefetch = 0 : i64, scratch_operands = 0 : i64, tpu.core_type = #tpu.core_type<tc>, window_params = [{transform_indices = @transform_0, window_bounds = array<i64: 8, 128>}, {transform_indices = @transform_1, window_bounds = array<i64: 8, 128>}, {transform_indices = @transform_2, window_bounds = array<i64: 8, 128>}]} {
    %c0_i32 = arith.constant 0 : i32
    %0 = arith.cmpi eq, %arg1, %c0_i32 : i32
    %1 = arith.extui %0 : i1 to i32
    %c0_i32_0 = arith.constant 0 : i32
    %2 = arith.cmpi ne, %1, %c0_i32_0 : i32
    scf.if %2 {
      %cst_20 = arith.constant 0.000000e+00 : f32
      %50 = vector.broadcast %cst_20 : f32 to vector<8x128xf32>
      %c0_21 = arith.constant 0 : index
      %c0_22 = arith.constant 0 : index
      %51 = vector.load %arg4[%c0_21, %c0_22] : memref<8x128xf32, #tpu.memory_space<vmem>>, vector<8x128xf32>
      tpu.vector_store %arg4[%c0_21, %c0_22], %50 {strides = array<i32>} : memref<8x128xf32, #tpu.memory_space<vmem>>, vector<8x128xf32>,
    } else {
    }
    %c0 = arith.constant 0 : index
    %c0_1 = arith.constant 0 : index
    %3 = vector.load %arg2[%c0, %c0_1] : memref<8x128xf32, #tpu.memory_space<vmem>>, vector<8x128xf32>
    %c0_2 = arith.constant 0 : index
    %c0_3 = arith.constant 0 : index
    %4 = vector.load %arg3[%c0_2, %c0_3] : memref<8x128xf32, #tpu.memory_space<vmem>>, vector<8x128xf32>
    %5 = math.absf %3 : vector<8x128xf32>
    %cst = arith.constant 0.000000e+00 : f32
    %6 = vector.broadcast %cst : f32 to vector<8x128xf32>
    %7 = arith.subf %6, %5 : vector<8x128xf32>
    %8 = math.exp %7 : vector<8x128xf32>
    %cst_4 = arith.constant 0.000000e+00 : f32
    %9 = vector.broadcast %cst_4 : f32 to vector<8x128xf32>
    %10 = arith.maximumf %3, %9 : vector<8x128xf32>
    %11 = arith.mulf %3, %4 : vector<8x128xf32>
    %12 = arith.subf %10, %11 : vector<8x128xf32>
    %13 = math.log1p %8 : vector<8x128xf32>
    %14 = arith.addf %12, %13 : vector<8x128xf32>
    %cst_5 = arith.constant 1.000000e+00 : f32
    %15 = vector.broadcast %cst_5 : f32 to vector<8x128xf32>
    %16 = arith.addf %15, %8 : vector<8x128xf32>
    %cst_6 = arith.constant 1.000000e+00 : f32
    %17 = vector.broadcast %cst_6 : f32 to vector<8x128xf32>
    %18 = arith.divf %17, %16 : vector<8x128xf32>
    %cst_7 = arith.constant 0.000000e+00 : f32
    %19 = vector.broadcast %cst_7 : f32 to vector<8x128xf32>
    %20 = arith.cmpf oge, %3, %19 : vector<8x128xf32>
    %21 = arith.mulf %8, %18 : vector<8x128xf32>
    %22 = arith.select %20, %18, %21 : vector<8x128xi1>, vector<8x128xf32>
    %23 = arith.mulf %4, %22 : vector<8x128xf32>
    %cst_8 = arith.constant 1.000000e+00 : f32
    %24 = vector.broadcast %cst_8 : f32 to vector<8x128xf32>
    %25 = arith.subf %24, %4 : vector<8x128xf32>
    %cst_9 = arith.constant 1.000000e+00 : f32
    %26 = vector.broadcast %cst_9 : f32 to vector<8x128xf32>
    %27 = arith.subf %26, %22 : vector<8x128xf32>
    %28 = arith.mulf %25, %27 : vector<8x128xf32>
    %29 = arith.addf %23, %28 : vector<8x128xf32>
    %cst_10 = arith.constant 2.500000e-01 : f32
    %30 = vector.broadcast %cst_10 : f32 to vector<8x128xf32>
    %31 = arith.mulf %4, %30 : vector<8x128xf32>
    %cst_11 = arith.constant 1.000000e+00 : f32
    %32 = vector.broadcast %cst_11 : f32 to vector<8x128xf32>
    %33 = arith.subf %32, %4 : vector<8x128xf32>
    %cst_12 = arith.constant 7.500000e-01 : f32
    %34 = vector.broadcast %cst_12 : f32 to vector<8x128xf32>
    %35 = arith.mulf %33, %34 : vector<8x128xf32>
    %36 = arith.addf %31, %35 : vector<8x128xf32>
    %cst_13 = arith.constant 1.000000e+00 : f32
    %37 = vector.broadcast %cst_13 : f32 to vector<8x128xf32>
    %38 = arith.subf %37, %29 : vector<8x128xf32>
    %cst_14 = arith.constant 0.000000e+00 : f32
    %39 = vector.broadcast %cst_14 : f32 to vector<8x128xf32>
    %40 = arith.maximumf %38, %39 : vector<8x128xf32>
    %41 = math.sqrt %40 : vector<8x128xf32>
    %42 = arith.mulf %40, %41 : vector<8x128xf32>
    %43 = arith.mulf %14, %36 : vector<8x128xf32>
    %44 = arith.mulf %43, %42 : vector<8x128xf32>
    %c0_15 = arith.constant 0 : index
    %c0_16 = arith.constant 0 : index
    %45 = vector.load %arg4[%c0_15, %c0_16] : memref<8x128xf32, #tpu.memory_space<vmem>>, vector<8x128xf32>
    %46 = vector.shape_cast %44 : vector<8x128xf32> to vector<1x8x128xf32>
    %cst_17 = arith.constant dense<0.000000e+00> : vector<8x128xf32>
    %47 = vector.multi_reduction <add>, %46, %cst_17 [0] : vector<1x8x128xf32> to vector<8x128xf32>
    %48 = arith.addf %45, %47 : vector<8x128xf32>
    %c0_18 = arith.constant 0 : index
    %c0_19 = arith.constant 0 : index
    %49 = vector.load %arg4[%c0_18, %c0_19] : memref<8x128xf32, #tpu.memory_space<vmem>>, vector<8x128xf32>
    tpu.vector_store %arg4[%c0_18, %c0_19], %48 {strides = array<i32>} : memref<8x128xf32, #tpu.memory_space<vmem>>, vector<8x128xf32>,
    return
  }
  func.func @transform_0(%arg0: i32, %arg1: i32) -> (i32, i32) {
    %c1_i32 = arith.constant 1 : i32
    %0 = arith.muli %arg0, %c1_i32 : i32
    %1 = arith.addi %0, %arg1 : i32
    %c0_i32 = arith.constant 0 : i32
    %c0_i32_0 = arith.constant 0 : i32
    return %1, %c0_i32 : i32, i32
  }
  func.func @transform_1(%arg0: i32, %arg1: i32) -> (i32, i32) {
    %c1_i32 = arith.constant 1 : i32
    %0 = arith.muli %arg0, %c1_i32 : i32
    %1 = arith.addi %0, %arg1 : i32
    %c0_i32 = arith.constant 0 : i32
    %c0_i32_0 = arith.constant 0 : i32
    return %1, %c0_i32 : i32, i32
  }
  func.func @transform_2(%arg0: i32, %arg1: i32) -> (i32, i32) {
    %c0_i32 = arith.constant 0 : i32
    %c0_i32_0 = arith.constant 0 : i32
    return %arg0, %c0_i32 : i32, i32
  }
}

</mosaic_0001>

<bundles_post_ra>
// kernel: tpu_custom_call.1
= control target key start
LH: loop header
LB: loop body
LE: loop exit
PB: predicated region body
PF: predicated region fallthrough
CT: control target
= control target key end

     0   :  { %7 = vsyncpa [#allocation3], 0  ;;  %s799_s0 = inlined_call_operand.hbm [shape: f32[16,128], index: 0, kind: input, shape index: {}]   ;;  %s800_s1 = inlined_call_operand.hbm [shape: f32[16,128], index: 1, kind: input, shape index: {}]   ;;  %s801_s2 = inlined_call_operand.hbm [shape: f32[16,128], index: 2, kind: output, shape index: {}]  }
   0x1   :  { %9 = vsyncpa [#allocation3 + $0x1], 0 }
   0x2   :  { %10 = vsyncpa [#allocation6], 0 }
   0x3   :  { %12 = vsyncpa [#allocation6 + $0x1], 0 }
   0x4   :  { %13 = vsyncpa [#allocation4], 0 }
   0x5   :  { %15 = vsyncpa [#allocation4 + $0x1], 0  ;;  %s666_s9 = smov 0   ;;  %s668_s10 = smov 0  }
   0x6   :  { %s670_s11 = smov 0   ;;  %s672_s12 = smov 0  }
   0x7   :  { %s674_s13 = smov 0   ;;  %s676_s14 = smov 0  }
   0x8 LB: > { %s411_s15 = sadd.s32 4294967295, %s649_s14   ;;  %s412_s16 = sadd.s32 4294967294, %s649_s14   ;;  %s649_s14 = sphi %s676_s14, %s21_s14   ;;  %s645_s13 = sphi %s674_s13, %s810_s13   ;;  %s641_s12 = sphi %s672_s12, %s809_s12   ;;  %s637_s11 = sphi %s670_s11, %s808_s11   ;;  %s633_s10 = sphi %s668_s10, %s807_s10   ;;  %s629_s9 = sphi %s666_s9, %s806_s9  }
   0x9   : > { %s33_s17 = sadd.s32 1, %s645_s13  ;;  %s42_s18 = sadd.s32 1, %s637_s11 }
   0xa   : > { %p35_p0 = scmp.ge.s32.totalorder %s33_s17, 2  ;;  %p49_p1 = scmp.ne.s32.totalorder %s637_s11, %s633_s10 }
   0xb   : > { %p50_p2 = scmp.eq.s32.totalorder %s649_s14, 0  ;;  %p55_p3 = scmp.ne.s32.totalorder %s633_s10, %s629_s9 }
   0xc   : > { %s812_s17 = smov (%p35_p0, %s33_s17), 0  ;;  %p56_p5 = scmp.eq.s32.totalorder %s411_s15, 0 }
   0xd   : > { %p707_p4 = por %p50_p2, %p49_p1  ;;  %s39_s20 = ssub.s32 %s645_s13, %s812_s17 }
   0xe   : > { %p107_p6 = scmp.eq.s32.totalorder %s411_s15, 1  ;;  %p40_p7 = scmp.eq.s32.totalorder %s39_s20, 0 }
   0xf   : > { %p713_p8 = por %p56_p5, %p55_p3  ;;  %p113_p10 = scmp.eq.s32.totalorder %s412_s16, 1 }
  0x10   : > { %p717_p9 = por %p107_p6, %p49_p1  ;;  %p414_p12 = scmp.ge.s32.totalorder %s649_s14, 2 }
  0x11   : > { %s722_s23 = scalar_select %p40_p7, %s637_s11, %s42_s18  }
  0x12   : > { %p724_p11 = por %p113_p10, %p55_p3  ;;  %p444_p13 = scmp.lt.s32.totalorder %s649_s14, 2 }
  0x13   : > { %s133_s25 = sand.u32 1, %s637_s11   ;;  %s416_s27 = sshll.u32 %s645_s13, 3 }
  0x14   : > { %s415_s26 = sshll.u32 %s133_s25, 3  ;;  %s142_s30 = scalar_lea.hbm %s799_s0, %s416_s27 }
  0x15   : > { %s137_s3 = scalar_lea.vmem [#allocation2], %s415_s26  ;;  %s144_s5 = sshll.u32 %s142_s30, 4  ;;  %s145_s5 = int_to_ptr.hbm [resolvable:$true] %s144_s5 }
  0x16   : > { %s146_s4 = sshll.u32 %s137_s3, 4  ;;  %p434_p0 = pnand %p444_p13, %p707_p4  ;;  %s147_s4 = int_to_ptr.vmem [resolvable:$true] %s146_s4 }
  0x17   : > { %p419_p1 = scmp.ge.s32.totalorder %s649_s14, 1  ;;  %p171_p2 = scmp.lt.s32.totalorder %s649_s14, 3 }
  0x18   : > { %s134_s6 = scalar_lea.sflag [#allocation3], %s133_s25  ;;  %s162_s15 = scalar_lea.hbm %s800_s1, %s416_s27 }
  0x19   : > { %436 = dma.hbm_to_vmem [thread:$0]  (!%p434_p0), %s145_s5, 128, %s147_s4, %s134_s6  }
  0x1a   : > { %p172_p3 = pnand %p419_p1, %p171_p2  ;;  %s157_s16 = scalar_lea.vmem [#allocation5], %s415_s26 }
  0x1b   : > { %s166_s18 = sshll.u32 %s157_s16, 4  ;;  %s164_s20 = sshll.u32 %s162_s15, 4  ;;  %s167_s18 = int_to_ptr.vmem [resolvable:$true] %s166_s18  ;;  %s165_s20 = int_to_ptr.hbm [resolvable:$true] %s164_s20 }
  0x1c   : > { %s154_s28 = scalar_lea.sflag [#allocation6], %s133_s25  ;;  %175 = sbr.rel (%p172_p3) target bundleno = 110 (0x6e), region = 28 }
  0x1d   : > { %439 = dma.hbm_to_vmem [thread:$0]  (!%p434_p0), %s165_s20, 128, %s167_s18, %s154_s28  }
  0x1e   : > { %s743_s19 = sand.u32 (!%p172_p3), 1, %s633_s10  }
  0x1f   : > { %s746_s29 = sshll.u32 (!%p172_p3), %s743_s19, 3  ;;  %s178_s30 = scalar_lea.sflag (!%p172_p3), [#allocation3], %s743_s19 }
  0x20   : > { %s181_s3 = scalar_lea.vmem (!%p172_p3), [#allocation2], %s746_s29 }
  0x21   : > { %616 = dma.done.wait (%p713_p8), %s178_s30, 128  }
  0x22   : > { %618 = vsyncadd (%p713_p8), %s178_s30, 4294967168  ;;  %s188_s25 = scalar_lea.sflag [#allocation6], %s743_s19  ;;  %s191_s26 = scalar_lea.vmem [#allocation5], %s746_s29 }
  0x23   : > { %620 = dma.done.wait (%p713_p8), %s188_s25, 128  }
  0x24   : > { %622 = vsyncadd (%p713_p8), %s188_s25, 4294967168  ;;  %v225_v0 = vld [vmem:[%s181_s3] sm:$0xff]  ;;  %v226_v14 = vld [vmem:[%s191_s26] sm:$0xff]  ;;  %s424_s21 = sshll.u32 %s641_s12, 3  ;;  %s217_s6 = scalar_lea.vmem [#allocation7], %s746_s29 }
  0x25   : > { %v227_v1 = vand.u32 2147483647, %v225_v0  ;;  %vm260_vm4 = vcmp.ge.f32.partialorder %v225_v0, 0.0  ;;  %v264_v18 = vsub.f32 1.0, %v226_v14  ;;  %v231_v31 = vmax.f32 %v225_v0, 0.0  ;;  %s303_s5 = scalar_lea.hbm %s801_s2, %s424_s21  ;;  %s305_s7 = sshll.u32 %s217_s6, 4  ;;  %s306_s7 = int_to_ptr.vmem [resolvable:$true] %s305_s7 }
  0x26   : > { %v232_v32 = vmul.f32 %v226_v14, %v225_v0  ;;  %v268_v38 = vmul.f32 0.25, %v226_v14  ;;  %s307_s8 = sshll.u32 %s303_s5, 4  ;;  %s293_s15 = scalar_lea.sflag [#allocation4], %s743_s19  ;;  %s308_s8 = int_to_ptr.hbm [resolvable:$true] %s307_s8 }
  0x27   : > { %v228_v2 = vsub.f32 0.0, %v227_v1  ;;  %v269_v39 = vmul.f32 0.75, %v264_v18  ;;  %s577_s12 = sshra.s32 %s308_s8, 4  ;;  %s583_s28 = scalar_lea.hbm %s801_s2, 16  ;;  %s578_s12 = int_to_ptr.hbm [resolvable:$true] %s577_s12 }
  0x28   : > { %v233_v37 = vsub.f32 %v231_v31, %v232_v32  ;;  %s579_s16 = scalar_lea.hbm %s578_s12, 8  ;;  %p584_p7 = scmp.lt.s32.totalorder %s578_s12, %s801_s2 }
  0x29   : > { %v229_v3 = vmul.f32 1.442695, %v228_v2  ;;  %v270_v44 = vadd.f32 %v269_v39, %v268_v38  ;;  %p580_p4 = scmp.ne.s32.totalorder %s578_s12, %s579_s16  ;;  %p585_p8 = scmp.lt.s32.totalorder %s583_s28, %s579_s16 }
  0x2b   : > { %495 = vpow2.f32 %v229_v3  ;;  %p581_p5 = pnand %p580_p4, %p717_p9  ;;  %p586_p10 = por %p585_p8, %p584_p7 }
  0x2d   : > { %p582_p6 = pneg %p581_p5 }
  0x2f   : > { %p587_p13 = pnand %p586_p10, %p582_p6 }
  0x31   : > { %v496_v4 = vpop.eup %495 }
  0x32   : > { %v234_v5 = vadd.f32 1.0, %v496_v4  ;;  %v237_v26 = vmul.f32 -0.5, %v496_v4  ;;  %v240_v29 = vand.u32 2147483647, %v496_v4 }
  0x34   : > { %497 = vrcp.f32 %v234_v5  ;;  %v256_v8 = vand.u32 2147483648, %v234_v5  ;;  %vm250_vm0 = vweird.f32 %v234_v5  ;;  %v254_v10 = vand.u32 2147483647, %v234_v5 }
  0x35   : > { %499 = vlog2.f32 %v234_v5  ;;  %v238_v27 = vadd.f32 1.0, %v237_v26  ;;  %vm241_vm5 = vcmp.lt.f32.partialorder %v240_v29, 0.0004427343 }
  0x36   : > { %v257_v12 = vor.u32 1.1754944e-38, %v256_v8  ;;  %vm255_vm3 = vcmp.eq.f32.partialorder %v254_v10, 8.507059e+37 }
  0x37   : > { %v239_v35 = vmul.f32 %v496_v4, %v238_v27 }
  0x3a   : > { %v498_v6 = vpop.eup %497 }
  0x3b   : > { %v246_v7 = vmul.f32 %v498_v6, %v234_v5  ;;  %vm251_vm1 = vweird.f32 %v498_v6  ;;  %v500_v28 = vpop.eup %499 }
  0x3c   : > { %vm252_vm2 = vmor %vm250_vm0, %vm251_vm1  ;;  %v236_v34 = vmul.f32 0.6931472, %v500_v28 }
  0x3d   : > { %v247_v9 = vsub.f32 1.0, %v246_v7 }
  0x3e   : > { %v242_v41 = vsel %vm241_vm5, %v239_v35, %v236_v34 }
  0x3f   : > { %v248_v11 = vmul.f32 %v498_v6, %v247_v9  ;;  %v243_v43 = vadd.f32 %v242_v41, %v233_v37 }
  0x41   : > { %v249_v13 = vadd.f32 %v498_v6, %v248_v11  ;;  %v286_v49 = vmul.f32 %v270_v44, %v243_v43 }
  0x43   : > { %v253_v15 = vsel %vm252_vm2, %v498_v6, %v249_v13 }
  0x44   : > { %v258_v16 = vsel %vm255_vm3, %v257_v12, %v253_v15 }
  0x45   : > { %v261_v17 = vmul.f32 %v496_v4, %v258_v16 }
  0x47   : > { %v262_v19 = vsel %vm260_vm4, %v258_v16, %v261_v17 }
  0x48   : > { %v263_v20 = vmul.f32 %v262_v19, %v226_v14  ;;  %v265_v21 = vsub.f32 1.0, %v262_v19 }
  0x4a   : > { %v266_v22 = vmul.f32 %v265_v21, %v264_v18 }
  0x4c   : > { %v267_v23 = vadd.f32 %v266_v22, %v263_v20 }
  0x4e   : > { %v271_v24 = vsub.f32 1.0, %v267_v23 }
  0x50   : > { %v272_v25 = vmax.f32 %v271_v24, 0.0 }
  0x52   : > { %501 = vrsqrt.f32 %v272_v25  ;;  %vm280_vm6 = vcmp.eq.f32.partialorder %v272_v25, inf  ;;  %v283_v46 = vand.u32 2147483648, %v272_v25  ;;  %vm282_vm7 = vcmp.eq.f32.partialorder %v272_v25, 0.0 }
  0x58   : > { %v502_v30 = vpop.eup %501 }
  0x59   : > { %v274_v33 = vmul.f32 %v502_v30, %v272_v25 }
  0x5b   : > { %v275_v36 = vmul.f32 %v502_v30, %v274_v33 }
  0x5d   : > { %v276_v40 = vmul.f32 0.5, %v275_v36 }
  0x5f   : > { %v277_v42 = vsub.f32 1.5, %v276_v40 }
  0x61   : > { %v278_v45 = vmul.f32 %v502_v30, %v277_v42 }
  0x63   : > { %v279_v47 = vmul.f32 %v278_v45, %v272_v25 }
  0x65   : > { %v281_v48 = vsel %vm280_vm6, %v272_v25, %v279_v47 }
  0x66   : > { %v284_v50 = vsel %vm282_vm7, %v283_v46, %v281_v48 }
  0x67   : > { %v285_v51 = vmul.f32 %v284_v50, %v272_v25 }
  0x69   : > { %v287_v52 = vmul.f32 %v286_v49, %v285_v51 }
  0x6b   : > { %291 = vst [vmem:[%s217_s6] sm:$0xff] %v287_v52 }
  0x6c   : > { %590 = shalt.err (!%p587_p13)
}
  0x6d   : > { %431 = dma.vmem_to_hbm [thread:$0]  (%p717_p9), %s306_s7, 128, %s308_s8, %s293_s15  }
  0x6e PF: > { %s319_s19 = sand.u32 1, %s629_s9   ;;  %p441_p0 = pnand %p414_p12, %p724_p11 }
  0x6f   : > { %s320_s3 = scalar_lea.sflag [#allocation4], %s319_s19 }
  0x70   : > { %p442_p1 = pneg %p441_p0 }
  0x72   : > { %624 = dma.done.wait (%p442_p1), %s320_s3, 128  }
  0x73   : > { %626 = vsyncadd (%p442_p1), %s320_s3, 4294967168  ;;  %s21_s14 = sadd.s32 1, %s649_s14   ;;  %s806_s9 = smov %s633_s10 }
  0x74   : > { %p18_p2 = scmp.ge.s32.totalorder %s21_s14, 4   ;;  %s807_s10 = smov %s637_s11 }
  0x75   : > { %s808_s11 = smov %s722_s23  ;;  %s809_s12 = smov %s645_s13 }
  0x76   : > { %s810_s13 = smov %s812_s17  ;;  %20 = sbr.rel (!%p18_p2) target bundleno = 8 (0x8), region = 90 }
  0x7b   :  { %326 = vsyncpa [#allocation3], 1 }
  0x7c   :  { %328 = vsyncpa [#allocation3 + $0x1], 1 }
  0x7d   :  { %329 = vsyncpa [#allocation6], 1 }
  0x7e   :  { %331 = vsyncpa [#allocation6 + $0x1], 1 }
  0x7f   :  { %332 = vsyncpa [#allocation4], 1 }
  0x80   :  { %334 = vsyncpa [#allocation4 + $0x1], 1 }

</bundles_post_ra>
